<compile_context>
chip_gen: v6e
topology: v6e:2x2x1
jax: 0.10.0
libtpu: 0.0.40
codegen_flags: <defaults>
</compile_context>

<pallas_src>
import math
import functools

import jax
import jax.numpy as jnp
from jax.experimental import pallas as pl
from jax.experimental.pallas import tpu as pltpu


def _inter_layer_kernel(cols_ref, x_ref, w1_ref, b1_ref, w2_ref, b2_ref,
                        gamma_ref, beta_ref, out_ref, *, eps):
    """One grid step == one tile of R independent (batch*time) rows.

    cols_ref:  (R, k*C)  bf16  wrapper-built im2col rows
    x_ref:     (R, C)    f32   original (unpadded) rows -> residual source
    w1_ref:    (k*C, I)  bf16  im2col-folded Conv1d(C->I, k) weight
    b1_ref:    (1, I)    f32
    w2_ref:    (I, C)    bf16  Conv1d(I->C, kernel_size=1) weight
    b2_ref:    (1, C)    f32
    gamma_ref: (1, C)    f32   LayerNorm weight
    beta_ref:  (1, C)    f32   LayerNorm bias
    out_ref:   (R, C)    f32
    """
    # Width-k conv == ONE fused MXU matmul over K = k*C (bf16 operands).
    h = jnp.dot(cols_ref[...], w1_ref[...],
                preferred_element_type=jnp.float32)
    h = jnp.maximum(h + b1_ref[...], 0.0)                 # bias + ReLU (f32)

    # 1x1 conv == second wide matmul (bf16 operands, f32 accumulate).
    y = jnp.dot(h.astype(jnp.bfloat16), w2_ref[...],
                preferred_element_type=jnp.float32)
    y = y + b2_ref[...]

    # Dropout == identity (eval mode).  Residual from the aligned f32 input.
    res = x_ref[...] + y

    # LayerNorm over the feature (lane) axis, PyTorch semantics (biased var).
    mu = jnp.mean(res, axis=-1, keepdims=True)
    d = res - mu
    var = jnp.mean(d * d, axis=-1, keepdims=True)
    inv = jax.lax.rsqrt(var + eps)                        # EUP slot
    out = d * inv * gamma_ref[...] + beta_ref[...]

    # Single full-tile store per grid step.
    out_ref[...] = out.astype(out_ref.dtype)


def _pick_row_tile(total_rows, target=512, min_steps=2):
    """Largest divisor R of total_rows with R<=target, >=min_steps grid steps,
    and R a multiple of 16 (bf16 sublane packing) or 8; else a single block."""
    candidates = [r for r in range(1, min(total_rows, target) + 1)
                  if total_rows % r == 0 and total_rows // r >= min_steps]
    for align in (16, 8):
        aligned = [r for r in candidates if r % align == 0]
        if aligned:
            return max(aligned)
    return total_rows


def inter_layer(x, params, kernel_size, eps=1e-5):
    """x: (B, S, model_size) float32.  Mirrors InterLayer.forward (eval mode)."""
    B, S, C = x.shape
    I = params["b1"].shape[-1]
    k = kernel_size
    assert k % 2 == 1, "padding='same' implemented for odd kernel sizes"
    pad = (k - 1) // 2

    # ---- Wrapper-side layout plumbing (XLA, done once outside the kernel) ----
    # im2col: pad the sequence axis, lane-concatenate the k shifted views, and
    # flatten batch*time into rows so the kernel's matmul M-dim is B*S.
    x_pad = jnp.pad(x, ((0, 0), (pad, pad), (0, 0)))
    cols = jnp.concatenate([x_pad[:, t:t + S, :] for t in range(k)], axis=-1)
    cols = cols.reshape(B * S, k * C).astype(jnp.bfloat16)          # (B*S, k*C)
    x_rows = x.reshape(B * S, C)                                    # (B*S, C) f32

    # Fold Conv1d(C->I, k) weight (I, C, k) -> im2col matrix (k*C, I), and the
    # 1x1 Conv1d(I->C) weight (C, I, 1) -> (I, C); cast both to bf16.
    w1 = jnp.transpose(params["w1_conv"], (2, 1, 0)).reshape(k * C, I)
    w1 = w1.astype(jnp.bfloat16)
    w2 = jnp.transpose(params["w2_conv"][:, :, 0], (1, 0)).astype(jnp.bfloat16)
    b1 = params["b1"].reshape(1, I).astype(jnp.float32)
    b2 = params["b2"].reshape(1, C).astype(jnp.float32)
    gamma = params["gamma"].reshape(1, C).astype(jnp.float32)
    beta = params["beta"].reshape(1, C).astype(jnp.float32)

    total_rows = B * S
    R = _pick_row_tile(total_rows)
    num_steps = total_rows // R

    # Advisory cost estimate for XLA's scheduler around the custom call.
    flops = 2 * total_rows * (k * C * I + I * C)
    bytes_accessed = (total_rows * k * C * 2      # im2col rows (bf16)
                      + total_rows * C * 4        # residual rows (f32)
                      + (k * C * I + I * C) * 2   # weights (bf16)
                      + (I + 3 * C) * 4           # biases / gamma / beta
                      + total_rows * C * 4)       # output (f32)
    cost = pl.CostEstimate(flops=flops, transcendentals=total_rows,
                           bytes_accessed=bytes_accessed)

    grid_spec = pltpu.PrefetchScalarGridSpec(
        num_scalar_prefetch=0,
        grid=(num_steps,),
        in_specs=[
            pl.BlockSpec((R, k * C), lambda i: (i, 0)),   # im2col rows (bf16)
            pl.BlockSpec((R, C), lambda i: (i, 0)),       # residual rows (f32)
            pl.BlockSpec((k * C, I), lambda i: (0, 0)),   # W1 (im2col, bf16)
            pl.BlockSpec((1, I), lambda i: (0, 0)),       # b1
            pl.BlockSpec((I, C), lambda i: (0, 0)),       # W2 (1x1, bf16)
            pl.BlockSpec((1, C), lambda i: (0, 0)),       # b2
            pl.BlockSpec((1, C), lambda i: (0, 0)),       # gamma
            pl.BlockSpec((1, C), lambda i: (0, 0)),       # beta
        ],
        out_specs=pl.BlockSpec((R, C), lambda i: (i, 0)),
    )

    out = pl.pallas_call(
        functools.partial(_inter_layer_kernel, eps=eps),
        out_shape=jax.ShapeDtypeStruct((total_rows, C), jnp.float32),
        grid_spec=grid_spec,
        compiler_params=pltpu.CompilerParams(
            dimension_semantics=("parallel",)),   # rows independent; >=2 steps
        cost_estimate=cost,
    )(cols, x_rows, w1, b1, w2, b2, gamma, beta)

    return out.reshape(B, S, C)


def _reference(x, params, kernel_size, eps=1e-5):
    """Plain-JAX f32 reference mirroring the PyTorch forward (eval mode)."""
    k = kernel_size
    pad = (k - 1) // 2
    xc = jnp.transpose(x, (0, 2, 1))                                  # (B, C, S)
    h = jax.lax.conv_general_dilated(
        xc, params["w1_conv"], window_strides=(1,), padding=[(pad, pad)],
        dimension_numbers=("NCH", "OIH", "NCH"))
    h = h + params["b1"][None, :, None]
    h = jnp.maximum(h, 0.0)
    y = jax.lax.conv_general_dilated(
        h, params["w2_conv"], window_strides=(1,), padding=[(0, 0)],
        dimension_numbers=("NCH", "OIH", "NCH"))
    y = y + params["b2"][None, :, None]
    res = jnp.transpose(xc + y, (0, 2, 1))                            # (B, S, C)
    mu = jnp.mean(res, axis=-1, keepdims=True)
    var = jnp.mean((res - mu) ** 2, axis=-1, keepdims=True)
    return (res - mu) * jax.lax.rsqrt(var + eps) * params["gamma"] + params["beta"]


if __name__ == "__main__":
    # Module hyperparameters (small, consistent with the forward pass).
    batch, seq_len = 2, 16
    model_size, inter_size, kernel_size, p_drop = 32, 64, 3, 0.1

    key = jax.random.PRNGKey(0)
    kx, k1, k2, k3, k4, k5, k6 = jax.random.split(key, 7)

    x = jax.random.normal(kx, (batch, seq_len, model_size), dtype=jnp.float32)

    # Deterministic parameter init (Conv1d-style fan-in uniform).
    bound1 = 1.0 / math.sqrt(model_size * kernel_size)
    bound2 = 1.0 / math.sqrt(inter_size)
    params = {
        "w1_conv": jax.random.uniform(k1, (inter_size, model_size, kernel_size),
                                      jnp.float32, -bound1, bound1),
        "b1": jax.random.uniform(k2, (inter_size,), jnp.float32, -bound1, bound1),
        "w2_conv": jax.random.uniform(k3, (model_size, inter_size, 1),
                                      jnp.float32, -bound2, bound2),
        "b2": jax.random.uniform(k4, (model_size,), jnp.float32, -bound2, bound2),
        "gamma": 1.0 + 0.05 * jax.random.normal(k5, (model_size,), jnp.float32),
        "beta": 0.05 * jax.random.normal(k6, (model_size,), jnp.float32),
    }

    out = inter_layer(x, params, kernel_size)
    out = jax.block_until_ready(out)

    ref = _reference(x, params, kernel_size)
    assert out.shape == (batch, seq_len, model_size), out.shape
    err = jnp.max(jnp.abs(out - ref))
    # bf16 MXU operands vs. the pure-f32 reference -> expect ~1e-3 abs error.
    assert jnp.allclose(out, ref, atol=1e-2, rtol=1e-2), f"max abs err {err}"

    print("KERNEL_OK")
</pallas_src>

<mosaic_0001>
module attributes {stable_mosaic.version = 11 : i64} {
  func.func @_inter_layer_kernel(%arg0: i32, %arg1: memref<16x96xbf16, #tpu.memory_space<vmem>>, %arg2: memref<16x32xf32, #tpu.memory_space<vmem>>, %arg3: memref<96x64xbf16, #tpu.memory_space<vmem>>, %arg4: memref<1x64xf32, #tpu.memory_space<vmem>>, %arg5: memref<64x32xbf16, #tpu.memory_space<vmem>>, %arg6: memref<1x32xf32, #tpu.memory_space<vmem>>, %arg7: memref<1x32xf32, #tpu.memory_space<vmem>>, %arg8: memref<1x32xf32, #tpu.memory_space<vmem>>, %arg9: memref<16x32xf32, #tpu.memory_space<vmem>>) attributes {dimension_semantics = [#tpu.dimension_semantics<parallel>], iteration_bounds = array<i64: 2>, scalar_prefetch = 0 : i64, scratch_operands = 0 : i64, tpu.core_type = #tpu.core_type<tc>, window_params = [{transform_indices = @transform_0, window_bounds = array<i64: 16, 96>}, {transform_indices = @transform_1, window_bounds = array<i64: 16, 32>}, {pipeline_mode = #tpu.pipeline_mode<synchronous>, transform_indices = @transform_2, window_bounds = array<i64: 96, 64>}, {pipeline_mode = #tpu.pipeline_mode<synchronous>, transform_indices = @transform_3, window_bounds = array<i64: 1, 64>}, {pipeline_mode = #tpu.pipeline_mode<synchronous>, transform_indices = @transform_4, window_bounds = array<i64: 64, 32>}, {pipeline_mode = #tpu.pipeline_mode<synchronous>, transform_indices = @transform_5, window_bounds = array<i64: 1, 32>}, {pipeline_mode = #tpu.pipeline_mode<synchronous>, transform_indices = @transform_6, window_bounds = array<i64: 1, 32>}, {pipeline_mode = #tpu.pipeline_mode<synchronous>, transform_indices = @transform_7, window_bounds = array<i64: 1, 32>}, {transform_indices = @transform_8, window_bounds = array<i64: 16, 32>}]} {
    %c0 = arith.constant 0 : index
    %c0_0 = arith.constant 0 : index
    %0 = vector.load %arg1[%c0, %c0_0] : memref<16x96xbf16, #tpu.memory_space<vmem>>, vector<16x96xbf16>
    %c0_1 = arith.constant 0 : index
    %c0_2 = arith.constant 0 : index
    %1 = vector.load %arg3[%c0_1, %c0_2] : memref<96x64xbf16, #tpu.memory_space<vmem>>, vector<96x64xbf16>
    %cst = arith.constant dense<0.000000e+00> : vector<16x64xf32>
    %2 = tpu.matmul %0, %1, %cst {dimension_numbers = #tpu.dot_dimension_numbers<[1], [0], [0], [1], [0, 0, 1, 1], [], []>} : vector<16x96xbf16>, vector<96x64xbf16>, vector<16x64xf32> -> vector<16x64xf32>
    %c0_3 = arith.constant 0 : index
    %c0_4 = arith.constant 0 : index
    %3 = vector.load %arg4[%c0_3, %c0_4] : memref<1x64xf32, #tpu.memory_space<vmem>>, vector<1x64xf32>
    %4 = vector.broadcast %3 : vector<1x64xf32> to vector<16x64xf32>
    %5 = arith.addf %2, %4 : vector<16x64xf32>
    %cst_5 = arith.constant 0.000000e+00 : f32
    %6 = vector.broadcast %cst_5 : f32 to vector<16x64xf32>
    %7 = arith.maximumf %5, %6 : vector<16x64xf32>
    %8 = arith.truncf %7 : vector<16x64xf32> to vector<16x64xbf16>
    %c0_6 = arith.constant 0 : index
    %c0_7 = arith.constant 0 : index
    %9 = vector.load %arg5[%c0_6, %c0_7] : memref<64x32xbf16, #tpu.memory_space<vmem>>, vector<64x32xbf16>
    %cst_8 = arith.constant dense<0.000000e+00> : vector<16x32xf32>
    %10 = tpu.matmul %8, %9, %cst_8 {dimension_numbers = #tpu.dot_dimension_numbers<[1], [0], [0], [1], [0, 0, 1, 1], [], []>} : vector<16x64xbf16>, vector<64x32xbf16>, vector<16x32xf32> -> vector<16x32xf32>
    %c0_9 = arith.constant 0 : index
    %c0_10 = arith.constant 0 : index
    %11 = vector.load %arg6[%c0_9, %c0_10] : memref<1x32xf32, #tpu.memory_space<vmem>>, vector<1x32xf32>
    %12 = vector.broadcast %11 : vector<1x32xf32> to vector<16x32xf32>
    %13 = arith.addf %10, %12 : vector<16x32xf32>
    %c0_11 = arith.constant 0 : index
    %c0_12 = arith.constant 0 : index
    %14 = vector.load %arg2[%c0_11, %c0_12] : memref<16x32xf32, #tpu.memory_space<vmem>>, vector<16x32xf32>
    %15 = arith.addf %14, %13 : vector<16x32xf32>
    %cst_13 = arith.constant dense<0.000000e+00> : vector<16xf32>
    %16 = vector.multi_reduction <add>, %15, %cst_13 [1] : vector<16x32xf32> to vector<16xf32>
    %17 = vector.shape_cast %16 : vector<16xf32> to vector<16x1xf32>
    %cst_14 = arith.constant 3.200000e+01 : f32
    %18 = vector.broadcast %cst_14 : f32 to vector<16x1xf32>
    %19 = arith.divf %17, %18 : vector<16x1xf32>
    %20 = vector.broadcast %19 : vector<16x1xf32> to vector<16x32xf32>
    %21 = arith.subf %15, %20 : vector<16x32xf32>
    %22 = arith.mulf %21, %21 : vector<16x32xf32>
    %cst_15 = arith.constant dense<0.000000e+00> : vector<16xf32>
    %23 = vector.multi_reduction <add>, %22, %cst_15 [1] : vector<16x32xf32> to vector<16xf32>
    %24 = vector.shape_cast %23 : vector<16xf32> to vector<16x1xf32>
    %cst_16 = arith.constant 3.200000e+01 : f32
    %25 = vector.broadcast %cst_16 : f32 to vector<16x1xf32>
    %26 = arith.divf %24, %25 : vector<16x1xf32>
    %cst_17 = arith.constant 9.99999974E-6 : f32
    %27 = vector.broadcast %cst_17 : f32 to vector<16x1xf32>
    %28 = arith.addf %26, %27 : vector<16x1xf32>
    %29 = math.rsqrt %28 : vector<16x1xf32>
    %30 = vector.broadcast %29 : vector<16x1xf32> to vector<16x32xf32>
    %31 = arith.mulf %21, %30 : vector<16x32xf32>
    %c0_18 = arith.constant 0 : index
    %c0_19 = arith.constant 0 : index
    %32 = vector.load %arg7[%c0_18, %c0_19] : memref<1x32xf32, #tpu.memory_space<vmem>>, vector<1x32xf32>
    %33 = vector.broadcast %32 : vector<1x32xf32> to vector<16x32xf32>
    %34 = arith.mulf %31, %33 : vector<16x32xf32>
    %c0_20 = arith.constant 0 : index
    %c0_21 = arith.constant 0 : index
    %35 = vector.load %arg8[%c0_20, %c0_21] : memref<1x32xf32, #tpu.memory_space<vmem>>, vector<1x32xf32>
    %36 = vector.broadcast %35 : vector<1x32xf32> to vector<16x32xf32>
    %37 = arith.addf %34, %36 : vector<16x32xf32>
    %c0_22 = arith.constant 0 : index
    %c0_23 = arith.constant 0 : index
    %38 = vector.load %arg9[%c0_22, %c0_23] : memref<16x32xf32, #tpu.memory_space<vmem>>, vector<16x32xf32>
    tpu.vector_store %arg9[%c0_22, %c0_23], %37 {strides = array<i32>} : memref<16x32xf32, #tpu.memory_space<vmem>>, vector<16x32xf32>,
    return
  }
  func.func @transform_0(%arg0: i32) -> (i32, i32) {
    %c0_i32 = arith.constant 0 : i32
    %c0_i32_0 = arith.constant 0 : i32
    return %arg0, %c0_i32 : i32, i32
  }
  func.func @transform_1(%arg0: i32) -> (i32, i32) {
    %c0_i32 = arith.constant 0 : i32
    %c0_i32_0 = arith.constant 0 : i32
    return %arg0, %c0_i32 : i32, i32
  }
  func.func @transform_2(%arg0: i32) -> (i32, i32) {
    %c0_i32 = arith.constant 0 : i32
    %c0_i32_0 = arith.constant 0 : i32
    %c0_i32_1 = arith.constant 0 : i32
    return %c0_i32, %c0_i32_0 : i32, i32
  }
  func.func @transform_3(%arg0: i32) -> (i32, i32) {
    %c0_i32 = arith.constant 0 : i32
    %c0_i32_0 = arith.constant 0 : i32
    %c0_i32_1 = arith.constant 0 : i32
    return %c0_i32, %c0_i32_0 : i32, i32
  }
  func.func @transform_4(%arg0: i32) -> (i32, i32) {
    %c0_i32 = arith.constant 0 : i32
    %c0_i32_0 = arith.constant 0 : i32
    %c0_i32_1 = arith.constant 0 : i32
    return %c0_i32, %c0_i32_0 : i32, i32
  }
  func.func @transform_5(%arg0: i32) -> (i32, i32) {
    %c0_i32 = arith.constant 0 : i32
    %c0_i32_0 = arith.constant 0 : i32
    %c0_i32_1 = arith.constant 0 : i32
    return %c0_i32, %c0_i32_0 : i32, i32
  }
  func.func @transform_6(%arg0: i32) -> (i32, i32) {
    %c0_i32 = arith.constant 0 : i32
    %c0_i32_0 = arith.constant 0 : i32
    %c0_i32_1 = arith.constant 0 : i32
    return %c0_i32, %c0_i32_0 : i32, i32
  }
  func.func @transform_7(%arg0: i32) -> (i32, i32) {
    %c0_i32 = arith.constant 0 : i32
    %c0_i32_0 = arith.constant 0 : i32
    %c0_i32_1 = arith.constant 0 : i32
    return %c0_i32, %c0_i32_0 : i32, i32
  }
  func.func @transform_8(%arg0: i32) -> (i32, i32) {
    %c0_i32 = arith.constant 0 : i32
    %c0_i32_0 = arith.constant 0 : i32
    return %arg0, %c0_i32 : i32, i32
  }
}

</mosaic_0001>

<bundles_post_ra>
// kernel: tpu_custom_call.1
= control target key start
LH: loop header
LB: loop body
LE: loop exit
PB: predicated region body
PF: predicated region fallthrough
CT: control target
= control target key end

     0   :  { %13 = vsyncpa [#allocation3], 0  ;;  %s1062_s0 = inlined_call_operand.vmem [shape: bf16[32,96], index: 0, kind: input, shape index: {}]   ;;  %s1063_s1 = inlined_call_operand.vmem [shape: f32[32,32], index: 1, kind: input, shape index: {}]   ;;  %s1064_s2 = inlined_call_operand.vmem [shape: bf16[96,64], index: 2, kind: input, shape index: {}]   ;;  %s1065_s3 = inlined_call_operand.vmem [shape: f32[1,64], index: 3, kind: input, shape index: {}]   ;;  %s1066_s4 = inlined_call_operand.vmem [shape: bf16[64,32], index: 4, kind: input, shape index: {}]   ;;  %s1067_s5 = inlined_call_operand.vmem [shape: f32[1,32], index: 5, kind: input, shape index: {}]   ;;  %s1068_s6 = inlined_call_operand.vmem [shape: f32[1,32], index: 6, kind: input, shape index: {}]   ;;  %s1069_s7 = inlined_call_operand.vmem [shape: f32[1,32], index: 7, kind: input, shape index: {}]   ;;  %s1070_s8 = inlined_call_operand.hbm [shape: f32[32,32], index: 8, kind: output, shape index: {}]  }
   0x1   :  { %15 = vsyncpa [#allocation3 + $0x1], 0  ;;  %s906_s27 = smov 0   ;;  %s908_s28 = smov 0  }
   0x2   :  { %s910_s29 = smov 0   ;;  %s912_s30 = smov 0  }
   0x3 LB: > { %s927_s9 = sadd.s32 4294967295, %s854_s30   ;;  %s664_s10 = sadd.s32 4294967294, %s854_s30   ;;  %s854_s30 = sphi %s912_s30, %s1076_s30   ;;  %s850_s29 = sphi %s910_s29, %s1075_s29   ;;  %s846_s28 = sphi %s908_s28, %s1074_s28   ;;  %s842_s27 = sphi %s906_s27, %s1073_s27  }
   0x4   : > { %s931_s11 = sadd.s32 1, %s854_s30   ;;  %s206_s12 = sadd.s32 1, %s850_s29 }
   0x5   : > { %s203_s13 = ssub.s32 %s854_s30, %s931_s11  ;;  %p216_p0 = scmp.ne.s32.totalorder %s850_s29, %s846_s28 }
   0x6   : > { %p204_p1 = scmp.eq.s32.totalorder %s203_s13, 0  ;;  %p217_p2 = scmp.eq.s32.totalorder %s927_s9, 1 }
   0x7   : > { %p222_p3 = scmp.ne.s32.totalorder %s846_s28, %s842_s27  ;;  %p223_p4 = scmp.eq.s32.totalorder %s664_s10, 1 }
   0x8   : > { %s942_s14 = scalar_select %p204_p1, %s850_s29, %s206_s12  }
   0x9   : > { %p944_p5 = por %p217_p2, %p216_p0  ;;  %p948_p6 = por %p223_p4, %p222_p3 }
   0xa   : > { %p667_p7 = scmp.ge.s32.totalorder %s854_s30, 1  ;;  %p277_p8 = scmp.lt.s32.totalorder %s854_s30, 3 }
   0xc   : > { %p278_p9 = pnand %p667_p7, %p277_p8 }
   0xd   : > { %s669_s21 = sshll.u32 (!%p278_p9), %s927_s9, 1  ;;  %s695_s18 = sshll.u32 (!%p278_p9), %s927_s9, 8 }
   0xe   : > { %281 = sbr.rel (%p278_p9) target bundleno = 770 (0x302), region = 52  ;;  %p317_p10 = scmp.lt.s32.totalorder (!%p278_p9), %s669_s21, 3 }
   0xf   : > { %s1017_s24 = scalar_lea.hbm (!%p278_p9), %s1070_s8, %s695_s18 }
  0x13   : > { %v779_v0 = vld [vmem:[%s1064_s2 + $0x28] sm:$0xff]   ;;  %v856_v1 = vmov 0.0   ;;  %v780_v2 = vld [vmem:[%s1064_s2 + $0x20] sm:$0xff]   ;;  %vm857_vm0 = vmmov 0   ;;  %v781_v3 = vld [vmem:[%s1064_s2 + $0x18] sm:$0xff]   ;;  %s1078_s21 = smov (!%p317_p10, %s669_s21), 3 }
  0x14   : > { %708 = vmatprep.subr.bf16.mxu0 %v856_v1  ;;  %724 = vmatprep.subr.bf16.mxu1 %v856_v1  ;;  %v786_v4 = vld [vmem:[%s1066_s4 + $0x18] sm:$0xff]   ;;  %s670_s26 = sshll.u32 %s1078_s21, 2  ;;  %v782_v5 = vld [vmem:[%s1064_s2 + $0x10] sm:$0xff]   ;;  %v783_v6 = vld [vmem:[%s1064_s2 + $0x8] sm:$0xff]   ;;  %vm392_vm1 = vcmask 785408   ;;  %vm479_vm2 = vcmask 523264  }
  0x15   : > { %709 = vmatpush3.bf16.msra.mxu0 %v779_v0  ;;  %720 = vmatprep.mubr.msk.bf16.mxu0 %vm857_vm0, %v856_v1  ;;  %s320_s13 = scalar_lea.vmem %s1062_s0, %s670_s26  ;;  %v784_v7 = vld [vmem:[%s1064_s2] sm:$0xff]   ;;  %v787_v9 = vld [vmem:[%s1066_s4 + $0x10] sm:$0xff]   ;;  %v788_v10 = vld [vmem:[%s1066_s4 + $0x8] sm:$0xff]   ;;  %s672_s19 = sshll.u32 %s1078_s21, 3  ;;  %vm528_vm3 = vcmask 261120  }
  0x16   : > { %710 = vmatprep.subr.bf16.mxu0 %v856_v1  ;;  %732 = vmatprep.mubr.msk.bf16.mxu1 %vm857_vm0, %v856_v1  ;;  %v785_v8 = vld [vmem:[%s320_s13] sm:$0xff]   ;;  %s326_s23 = scalar_lea.vmem %s1063_s1, %s672_s19  ;;  %s313_s21 = sand.u32 1, %s846_s28  }
  0x17   : > { %725 = vmatpush3.bf16.msra.mxu1 %v786_v4  ;;  %v789_v11 = vld [vmem:[%s1066_s4] sm:$0xff]   ;;  %v525_v29 = vld [vmem:[%s326_s23 + $0x8] sm:$0xff]  ;;  %s668_s12 = sshll.u32 %s313_s21, 4  ;;  %s1022_s25 = scalar_lea.sflag [#allocation3], %s313_s21 }
  0x18   : > { %726 = vmatprep.subr.bf16.mxu1 %v856_v1  ;;  %v673_v12 = vld [vmem:[%s1065_s3] ss:$0 sm:$0xff]  ;;  %s315_s19 = scalar_lea.vmem [#allocation2], %s668_s12  ;;  %s858_s26 = smov [#allocation2]  }
  0x19   : > { %711 = vmatpush3.bf16.msra.mxu0 %v780_v2  ;;  %v682_v22 = vld [vmem:[%s1067_s5] ss:$0 sm:$0xff]  ;;  %s590_s20 = sshll.u32 %s315_s19, 4  ;;  %s798_s10 = sshll.u32 %s858_s26, 4  ;;  %s1019_s20 = int_to_ptr.vmem [resolvable:$true] %s590_s20  ;;  %s799_s10 = int_to_ptr.vmem [resolvable:$false] %s798_s10 }
  0x1a   : > { %712 = vmatprep.subr.bf16.mxu0 %v856_v1  ;;  %v524_v24 = vld [vmem:[%s326_s23] sm:$0xff]  ;;  %s794_s9 = scalar_lea.vmem %s1019_s20, 256  ;;  %s800_s12 = scalar_lea.vmem %s799_s10, 512 }
  0x1b   : > { %727 = vmatpush3.bf16.msra.mxu1 %v787_v9  ;;  %v688_v52 = vld [vmem:[%s1068_s6] ss:$0 sm:$0xff]  ;;  %p795_p11 = scmp.ne.s32.totalorder %s1019_s20, %s794_s9  ;;  %p801_p0 = scmp.lt.s32.totalorder %s1019_s20, %s799_s10 }
  0x1c   : > { %728 = vmatprep.subr.bf16.mxu1 %v856_v1  ;;  %v689_v54 = vld [vmem:[%s1069_s7] ss:$0 sm:$0xff]  ;;  %p802_p1 = scmp.lt.s32.totalorder %s800_s12, %s794_s9 }
  0x1d   : > { %713 = vmatpush3.bf16.msra.mxu0 %v781_v3  ;;  %p796_p12 = pnand %p795_p11, %p944_p5 }
  0x1e   : > { %714 = vmatprep.subr.bf16.mxu0 %v856_v1  ;;  %p803_p2 = por %p802_p1, %p801_p0 }
  0x1f   : > { %729 = vmatpush3.bf16.msra.mxu1 %v788_v10  ;;  %p797_p13 = pneg %p796_p12 }
  0x20   : > { %730 = vmatprep.subr.bf16.mxu1 %v856_v1 }
  0x21   : > { %715 = vmatpush3.bf16.msra.mxu0 %v782_v5  ;;  %p804_p3 = pnand %p803_p2, %p797_p13 }
  0x22   : > { %716 = vmatprep.subr.bf16.mxu0 %v856_v1 }
  0x23   : > { %731 = vmatpush3.bf16.msra.mxu1 %v789_v11 }
  0x25   : > { %717 = vmatpush3.bf16.msra.mxu0 %v783_v6 }
  0x26   : > { %718 = vmatprep.subr.bf16.mxu0 %v856_v1 }
  0x29   : > { %719 = vmatpush3.bf16.msra.mxu0 %v784_v7 }
  0x2c   : > { %721 = vmatmul.mubr.msk.bf16.vlgmr.msra.gmra.mxu0 %vm392_vm1, %v785_v8 }
  0xec   : > { %v430_v13 = vpop.f32.mrf.mxu0 }
  0xed   : > { %v431_v15 = vadd.f32 %v673_v12, %v430_v13 }
  0xee   : > { %v722_v14 = vpop.f32.mrf.mxu0 }
  0xef   : > { %v437_v19 = vmax.f32 %v431_v15, 0.0 }
  0xf0   : > { %v433_v16 = vpop.f32.mrf.mxu0 }
  0xf1   : > { %v434_v17 = vadd.f32 %v673_v12, %v433_v16 }
  0xf2   : > { %v723_v18 = vpop.f32.mrf.mxu0 }
  0xf3   : > { %v438_v20 = vmax.f32 %v434_v17, 0.0 }
  0xf5   : > { %v439_v21 = vpack.c.bf16 %v438_v20, %v437_v19 }
  0xf7   : > { %733 = vmatmul.mubr.msk.bf16.vlgmr.msra.gmra.mxu1 %vm479_vm2, %v439_v21 }
 0x1b7   : > { %v517_v23 = vpop.f32.mrf.mxu1 }
 0x1b8   : > { %v518_v25 = vadd.f32 %v682_v22, %v517_v23 }
 0x1b9   : > { %v734_v26 = vpop.f32.mrf.mxu1 }
 0x1ba   : > { %v526_v27 = vadd.f32 %v524_v24, %v518_v25 }
 0x1bb   : > { %v520_v28 = vpop.f32.mrf.mxu1 }
 0x1bc   : > { %v521_v30 = vadd.f32 %v682_v22, %v520_v28  ;;  %v529_v31 = vsel %vm528_vm3, %v526_v27, 0.0 }
 0x1bd   : > { %530 = vadd.xlane.f32.xlu0 %v529_v31  ;;  %v735_v32 = vpop.f32.mrf.mxu1 }
 0x1be   : > { %v527_v33 = vadd.f32 %v525_v29, %v521_v30 }
 0x1c0   : > { %v532_v34 = vsel %vm528_vm3, %v527_v33, 0.0 }
 0x1c1   : > { %533 = vadd.xlane.f32.xlu0 %v532_v34 }
 0x246   : > { %v531_v35 = vpop.xlane.xlu0 %530 }
 0x247   : > { %v536_v36 = vmul.f32 0.03125, %v531_v35 }
 0x249   : > { %v538_v37 = vsub.f32 %v526_v27, %v536_v36 }
 0x24a   : > { %v534_v38 = vpop.xlane.xlu0 %533 }
 0x24b   : > { %v537_v39 = vmul.f32 0.03125, %v534_v38  ;;  %v540_v40 = vmul.f32 %v538_v37, %v538_v37 }
 0x24d   : > { %v539_v41 = vsub.f32 %v527_v33, %v537_v39  ;;  %v542_v42 = vsel %vm528_vm3, %v540_v40, 0.0 }
 0x24e   : > { %543 = vadd.xlane.f32.xlu1 %v542_v42 }
 0x24f   : > { %v541_v43 = vmul.f32 %v539_v41, %v539_v41 }
 0x251   : > { %v545_v44 = vsel %vm528_vm3, %v541_v43, 0.0 }
 0x252   : > { %546 = vadd.xlane.f32.xlu1 %v545_v44 }
 0x2d7   : > { %v544_v45 = vpop.xlane.xlu1 %543 }
 0x2d8   : > { %v548_v46 = vmul.f32 0.03125, %v544_v45 }
 0x2da   : > { %v550_v47 = vadd.f32 1e-05, %v548_v46 }
 0x2db   : > { %v547_v48 = vpop.xlane.xlu1 %546 }
 0x2dc   : > { %790 = vrsqrt.f32 %v550_v47  ;;  %v549_v49 = vmul.f32 0.03125, %v547_v48 }
 0x2de   : > { %v551_v50 = vadd.f32 1e-05, %v549_v49 }
 0x2e0   : > { %792 = vrsqrt.f32 %v551_v50 }
 0x2e9   : > { %v791_v51 = vpop.eup %790 }
 0x2ea   : > { %v554_v53 = vmul.f32 %v791_v51, %v538_v37 }
 0x2ec   : > { %v563_v55 = vmul.f32 %v688_v52, %v554_v53 }
 0x2ed   : > { %v793_v56 = vpop.eup %792 }
 0x2ee   : > { %v555_v57 = vmul.f32 %v793_v56, %v539_v41  ;;  %v572_v58 = vadd.f32 %v689_v54, %v563_v55 }
 0x2f0   : > { %v564_v59 = vmul.f32 %v688_v52, %v555_v57  ;;  %574 = vst.msk [vmem:[%s315_s19] sm:$0xff] %vm528_vm3, %v572_v58 }
 0x2f2   : > { %v573_v60 = vadd.f32 %v689_v54, %v564_v59 }
 0x2f4   : > { %575 = vst.msk [vmem:[%s315_s19 + $0x8] sm:$0xff] %vm528_vm3, %v573_v60 }
 0x2f5   : > { %807 = shalt.err (!%p804_p3)
}
 0x2f6   : > { %s808_s21 = scalar_lea.hbm %s1017_s24, 256  ;;  %s812_s18 = scalar_lea.hbm %s1070_s8, 512 }
 0x2f7   : > { %p809_p4 = scmp.ne.s32.totalorder %s1017_s24, %s808_s21  ;;  %p813_p9 = scmp.lt.s32.totalorder %s1017_s24, %s1070_s8 }
 0x2f8   : > { %p814_p10 = scmp.lt.s32.totalorder %s812_s18, %s808_s21 }
 0x2f9   : > { %p810_p7 = pnand %p809_p4, %p944_p5 }
 0x2fa   : > { %p815_p11 = por %p814_p10, %p813_p9 }
 0x2fb   : > { %p811_p8 = pneg %p810_p7 }
 0x2fd   : > { %p816_p12 = pnand %p815_p11, %p811_p8 }
 0x2ff   : > { %819 = shalt.err (!%p816_p12)
}
 0x300   : > { %s859_s23 = smov 128   ;;  %s860_s9 = smov 8  }
 0x301   : > { %736 = dma.vmem_to_hbm [thread:$0]  (%p944_p5), %s1019_s20, 256, %s1017_s24, %s1022_s25, %s859_s23, %s859_s23, %s860_s9  }
 0x302 PF: > { %p742_p13 = scmp.ge.s32.totalorder %s854_s30, 2  ;;  %s605_s26 = sand.u32 1, %s842_s27  }
 0x303   : > { %s606_s10 = scalar_lea.sflag [#allocation3], %s605_s26 }
 0x304   : > { %p739_p0 = pnand %p742_p13, %p948_p6 }
 0x306   : > { %p740_p1 = pneg %p739_p0 }
 0x308   : > { %837 = dma.done.wait (%p740_p1), %s606_s10, 256  }
 0x309   : > { %839 = vsyncadd (%p740_p1), %s606_s10, 4294967040  ;;  %p18_p2 = scmp.ge.s32.totalorder %s931_s11, 4   ;;  %s1073_s27 = smov %s846_s28 }
 0x30a   : > { %s1074_s28 = smov %s850_s29  ;;  %s1075_s29 = smov %s942_s14 }
 0x30b   : > { %s1076_s30 = smov %s931_s11  ;;  %20 = sbr.rel (!%p18_p2) target bundleno = 3 (0x3), region = 90 }
 0x310   :  { %611 = vsyncpa [#allocation3], 1 }
 0x311   :  { %613 = vsyncpa [#allocation3 + $0x1], 1 }

</bundles_post_ra>
